<compile_context>
chip_gen: v5e
topology: v5e:2x2
jax: 0.10.0
libtpu: 0.0.40
codegen_flags: <defaults>
</compile_context>

<pallas_src>
import jax
import jax.numpy as jnp
from jax.experimental import pallas as pl
from jax.experimental.pallas import tpu as pltpu


def _pick_seq_block(L, target=256):
    """Largest divisor of L that is <= target (prefer sublane-aligned multiples of 8)."""
    if L <= target:
        return L
    best = 1
    start = target - (target % 8)
    for t in range(start, 0, -8):          # prefer multiples of 8
        if L % t == 0:
            best = t
            break
    if best == 1:
        for t in range(target, 0, -1):
            if L % t == 0:
                best = t
                break
    # Awkward L (e.g. prime): fall back to a dense cumsum rather than a degenerate loop.
    if best * 16 < min(L, target):
        best = L
    return best


def _blocked_cumsum(a, tri):
    """Inclusive cumsum of a:(L, W) along axis 0.

    Uses a (tblk, tblk) lower-triangular ones matmul per sequence block plus an
    f32 running carry row (last row of the previous cumulative block)."""
    tblk = tri.shape[0]
    L, W = a.shape
    nblk = L // tblk
    first = jnp.dot(tri, a[:tblk, :], preferred_element_type=jnp.float32)
    if nblk == 1:
        return first
    outs = [first]
    carry = first[tblk - 1:tblk, :]
    for b in range(1, nblk):
        blk = a[b * tblk:(b + 1) * tblk, :]
        cs = jnp.dot(tri, blk, preferred_element_type=jnp.float32) + carry
        outs.append(cs)
        carry = cs[tblk - 1:tblk, :]
    return jnp.concatenate(outs, axis=0)


def _attn_kernel(x_ref, tri_ref, wa_ref, ba_ref, wp_ref, bp_ref,
                 r_ref, e_ref, temp_ref, shift_ref, o_ref):
    x = x_ref[...]              # (L, B*Cin) f32, B batch samples stacked on the lane axis
    tri = tri_ref[...]          # (tblk, tblk) lower-triangular ones (resident across steps)

    # c_attn: 1x1 conv over channels == matmul with a block-diagonal (per-batch) weight.
    w = jnp.dot(x, wa_ref[...], preferred_element_type=jnp.float32) + ba_ref[...]
    w_sq = w * w                                               # (L, B*Cout)

    # denom = cumsum over the sequence axis for ALL heads / batches (blocked prefix-sum).
    denom = _blocked_cumsum(w_sq, tri)
    inv_denom = pl.reciprocal(jnp.maximum(denom, 1e-12))       # clamp_min + exact reciprocal

    # tmp[l, bh] = (sum_d w_sq/denom + head_dim*denom_bias[h]) * temp[h]
    # head_dim reduction as one matmul with the block-diagonal ones R;
    # denom_bias folded into shift = head_dim * denom_bias on the host.
    tmp = jnp.dot(w_sq * inv_denom, r_ref[...], preferred_element_type=jnp.float32)
    tmp = (tmp + shift_ref[...]) * temp_ref[...]               # (L, B*n_head)

    # Softmax over the sequence axis (per head / per batch column).
    tmp = tmp - jnp.max(tmp, axis=0, keepdims=True)
    ex = jnp.exp(tmp)
    pi = ex * pl.reciprocal(jnp.sum(ex, axis=0, keepdims=True))  # (L, B*n_head)

    # Broadcast pi per head to channel width via block-diagonal ones matmul.
    pi_full = jnp.dot(pi, e_ref[...], preferred_element_type=jnp.float32)  # (L, B*Cout)

    # Two separate blocked cumsums (no lane-misaligned concat/slice).
    cs_num = _blocked_cumsum(w_sq * pi_full, tri)              # cumsum(w_sq * Pi)
    cs_pi = _blocked_cumsum(pi, tri)                           # cumsum(Pi), head space
    inv_cs_pi = pl.reciprocal(cs_pi + 1e-8)
    dots = cs_num * jnp.dot(inv_cs_pi, e_ref[...], preferred_element_type=jnp.float32)
    attn = pl.reciprocal(1.0 + dots)
    # attn_dropout: identity (eval mode)

    y = -(w * pi_full) * attn                                  # (L, B*Cout)

    # c_proj (block-diag 1x1 conv) + identity residual + ReLU; resid_dropout: identity.
    out = jnp.dot(y, wp_ref[...], preferred_element_type=jnp.float32) + bp_ref[...]
    o_ref[...] = jnp.maximum(out + x, 0.0)


def linear_self_attention_temporal(x_nctv, params, n_head):
    # TODO(synk): stride > 1 (AvgPool2d on x and conv+pool residual branch) and
    # in_channels != out_channels residual conv are not implemented; only the default
    # stride=1 / identity-residual / eval-mode-dropout path is covered.
    N, C, T, V = x_nctv.shape
    Cout = params["wa"].shape[0]
    assert C == Cout, "only the in_channels == out_channels identity-residual path is implemented"
    head_dim = Cout // n_head
    L = T * V

    # Batch folding along the lane axis for lane density / MXU fill.
    b_cap = max(1, 256 // max(Cout, 1))
    B = 1
    for cand in range(min(N, b_cap), 0, -1):
        if N % cand == 0:
            B = cand
            break
    steps = N // B
    BC, BCo, BH = B * C, B * Cout, B * n_head

    # NCHW -> (steps, L, B*C): sequence ordered (t, v); batches stacked batch-major,
    # channel-minor along the lane axis.
    x_nlc = jnp.transpose(x_nctv, (0, 2, 3, 1)).reshape(N, L, C).astype(jnp.float32)
    x_slab = (x_nlc.reshape(steps, B, L, C)
                    .transpose(0, 2, 1, 3)
                    .reshape(steps, L, BC))

    eye_b = jnp.eye(B, dtype=jnp.float32)
    wa_t = params["wa"].reshape(Cout, C).T.astype(jnp.float32)       # (Cin, Cout)
    wp_t = params["wp"].reshape(Cout, Cout).T.astype(jnp.float32)    # (Cout, Cout)
    wa_bd = jnp.kron(eye_b, wa_t)                                    # (B*C, B*Cout)
    wp_bd = jnp.kron(eye_b, wp_t)                                    # (B*Cout, B*Cout)
    ba = jnp.tile(params["ba"].reshape(1, Cout).astype(jnp.float32), (1, B))
    bp = jnp.tile(params["bp"].reshape(1, Cout).astype(jnp.float32), (1, B))
    temp = jnp.tile(params["temp"].reshape(1, n_head).astype(jnp.float32), (1, B))
    shift = jnp.tile((head_dim * params["denom_bias"].reshape(1, n_head)).astype(jnp.float32),
                     (1, B))

    # Block-diagonal ones matrices for head-batched reduce / broadcast.
    heads = jnp.arange(Cout, dtype=jnp.int32) // head_dim
    r_mat = (heads[:, None] == jnp.arange(n_head)[None, :]).astype(jnp.float32)  # (Cout, n_head)
    r_bd = jnp.kron(eye_b, r_mat)                                    # (B*Cout, B*n_head)
    e_bd = r_bd.T                                                    # (B*n_head, B*Cout)

    # Blocked prefix-sum: tri is only (tblk, tblk), never (L, L).
    tblk = _pick_seq_block(L)
    nblk = L // tblk
    tri = jnp.tril(jnp.ones((tblk, tblk), jnp.float32))

    # VMEM budget: double-buffered slabs + resident constants + kernel temporaries,
    # capped per generation (~85% of physical VMEM, queried when available).
    work_f32 = (2 * (L * BC + L * BCo)
                + 2 * (tblk * tblk + BC * BCo + BCo * BCo + 2 * BCo * BH + 2 * BCo + 2 * BH)
                + 14 * L * BCo + 8 * L * BH)
    est_bytes = 4 * work_f32
    try:
        cap = int(pltpu.get_tpu_info().vmem_capacity_bytes)
    except Exception:
        cap = 64 * 1024 * 1024
    vmem_limit = int(min(max(est_bytes, 32 * 1024 * 1024), int(0.85 * cap)))

    flops = steps * (2 * L * BC * BCo + 2 * L * BCo * BCo + 6 * L * BCo * BH
                     + 2 * nblk * tblk * tblk * (2 * BCo + BH))
    bytes_accessed = 4 * (steps * L * (BC + BCo) + tblk * tblk + BC * BCo + BCo * BCo
                          + 2 * BCo * BH + 2 * BCo + 2 * BH)
    cost = pl.CostEstimate(flops=int(flops),
                           transcendentals=int(steps * L * BH),
                           bytes_accessed=int(bytes_accessed))

    out_slab = pl.pallas_call(
        _attn_kernel,
        out_shape=jax.ShapeDtypeStruct((steps, L, BCo), jnp.float32),
        grid=(steps,),
        in_specs=[
            pl.BlockSpec((None, L, BC), lambda n: (n, 0, 0)),      # x slab (step squeezed)
            pl.BlockSpec((tblk, tblk), lambda n: (0, 0)),          # tri block (resident)
            pl.BlockSpec((BC, BCo), lambda n: (0, 0)),             # c_attn weight^T (block-diag)
            pl.BlockSpec((1, BCo), lambda n: (0, 0)),              # c_attn bias
            pl.BlockSpec((BCo, BCo), lambda n: (0, 0)),            # c_proj weight^T (block-diag)
            pl.BlockSpec((1, BCo), lambda n: (0, 0)),              # c_proj bias
            pl.BlockSpec((BCo, BH), lambda n: (0, 0)),             # head-reduce ones R
            pl.BlockSpec((BH, BCo), lambda n: (0, 0)),             # head-broadcast ones E
            pl.BlockSpec((1, BH), lambda n: (0, 0)),               # temp (per head, tiled)
            pl.BlockSpec((1, BH), lambda n: (0, 0)),               # head_dim * denom_bias
        ],
        out_specs=pl.BlockSpec((None, L, BCo), lambda n: (n, 0, 0)),
        compiler_params=pltpu.CompilerParams(
            dimension_semantics=("parallel",),
            vmem_limit_bytes=vmem_limit),
        cost_estimate=cost,
    )(x_slab, tri, wa_bd, ba, wp_bd, bp, r_bd, e_bd, temp, shift)

    # (steps, L, B*Cout) -> (N, Cout, T, V)
    out = (out_slab.reshape(steps, L, B, Cout)
                   .transpose(0, 2, 1, 3)
                   .reshape(N, T, V, Cout)
                   .transpose(0, 3, 1, 2))
    return out


def reference_forward(x, params, n_head):
    """Pure-JAX transcription of the PyTorch forward (eval mode), NCHW layout."""
    N, C, T, V = x.shape
    Cout = params["wa"].shape[0]
    head_dim = Cout // n_head
    res = x
    wa = params["wa"].reshape(Cout, C)
    w = jnp.einsum("nctv,oc->notv", x, wa) + params["ba"].reshape(1, Cout, 1, 1)
    w = (w.reshape(N, n_head, head_dim, T, V)
          .transpose(0, 1, 3, 4, 2)
          .reshape(N, n_head, T * V, head_dim))
    w_sq = w ** 2
    denom = jnp.maximum(jnp.cumsum(w_sq, axis=2), 1e-12)
    w_normed = w_sq / denom + params["denom_bias"].reshape(1, n_head, 1, 1)
    tmp = jnp.sum(w_normed, axis=-1) * params["temp"].reshape(1, n_head, 1)
    Pi = jax.nn.softmax(tmp, axis=2)
    dots = (jnp.cumsum(w_sq * Pi[..., None], axis=2)
            / (jnp.cumsum(Pi, axis=2) + 1e-8)[..., None])
    attn = 1.0 / (1.0 + dots)
    y = -(w * Pi[..., None]) * attn
    y = (y.reshape(N, n_head, T, V, head_dim)
          .transpose(0, 1, 4, 2, 3)
          .reshape(N, Cout, T, V))
    wp = params["wp"].reshape(Cout, Cout)
    y = jnp.einsum("nctv,oc->notv", y, wp) + params["bp"].reshape(1, Cout, 1, 1)
    return jnp.maximum(y + res, 0.0)


if __name__ == "__main__":
    # Small shapes consistent with the module: N=2, C_in=C_out=32, T=8, V=4, 8 heads.
    N, C, T, V = 2, 32, 8, 4
    n_head = 8
    Cout = C

    key = jax.random.PRNGKey(0)
    kx, k1, k2, k3, k4, k5, k6 = jax.random.split(key, 7)
    x = jax.random.normal(kx, (N, C, T, V), dtype=jnp.float32)

    params = {
        "wa": 0.1 * jax.random.normal(k1, (Cout, C), dtype=jnp.float32),      # c_attn weight (1x1)
        "ba": 0.1 * jax.random.normal(k2, (Cout,), dtype=jnp.float32),        # c_attn bias
        "wp": 0.1 * jax.random.normal(k3, (Cout, Cout), dtype=jnp.float32),   # c_proj weight (1x1)
        "bp": 0.1 * jax.random.normal(k4, (Cout,), dtype=jnp.float32),        # c_proj bias
        "temp": 1.0 + 0.1 * jax.random.normal(k5, (n_head, 1), dtype=jnp.float32),
        "denom_bias": 0.1 * jax.random.normal(k6, (n_head, 1, 1), dtype=jnp.float32),
    }

    out = linear_self_attention_temporal(x, params, n_head)
    out = jax.block_until_ready(out)

    ref = jax.block_until_ready(reference_forward(x, params, n_head))
    assert out.shape == (N, Cout, T, V)
    assert jnp.allclose(out, ref, rtol=1e-4, atol=1e-4), float(jnp.max(jnp.abs(out - ref)))

    print("KERNEL_OK")
</pallas_src>

<mosaic_0001>
module attributes {stable_mosaic.version = 11 : i64} {
  func.func @_attn_kernel(%arg0: i32, %arg1: memref<1x32x64xf32, #tpu.memory_space<vmem>>, %arg2: memref<32x32xf32, #tpu.memory_space<vmem>>, %arg3: memref<64x64xf32, #tpu.memory_space<vmem>>, %arg4: memref<1x64xf32, #tpu.memory_space<vmem>>, %arg5: memref<64x64xf32, #tpu.memory_space<vmem>>, %arg6: memref<1x64xf32, #tpu.memory_space<vmem>>, %arg7: memref<64x16xf32, #tpu.memory_space<vmem>>, %arg8: memref<16x64xf32, #tpu.memory_space<vmem>>, %arg9: memref<1x16xf32, #tpu.memory_space<vmem>>, %arg10: memref<1x16xf32, #tpu.memory_space<vmem>>, %arg11: memref<1x32x64xf32, #tpu.memory_space<vmem>>) attributes {dimension_semantics = [#tpu.dimension_semantics<parallel>], iteration_bounds = array<i64: 1>, scalar_prefetch = 0 : i64, scratch_operands = 0 : i64, tpu.core_type = #tpu.core_type<tc>, window_params = [{transform_indices = @transform_0, window_bounds = array<i64: 1, 32, 64>}, {pipeline_mode = #tpu.pipeline_mode<synchronous>, transform_indices = @transform_1, window_bounds = array<i64: 32, 32>}, {pipeline_mode = #tpu.pipeline_mode<synchronous>, transform_indices = @transform_2, window_bounds = array<i64: 64, 64>}, {pipeline_mode = #tpu.pipeline_mode<synchronous>, transform_indices = @transform_3, window_bounds = array<i64: 1, 64>}, {pipeline_mode = #tpu.pipeline_mode<synchronous>, transform_indices = @transform_4, window_bounds = array<i64: 64, 64>}, {pipeline_mode = #tpu.pipeline_mode<synchronous>, transform_indices = @transform_5, window_bounds = array<i64: 1, 64>}, {pipeline_mode = #tpu.pipeline_mode<synchronous>, transform_indices = @transform_6, window_bounds = array<i64: 64, 16>}, {pipeline_mode = #tpu.pipeline_mode<synchronous>, transform_indices = @transform_7, window_bounds = array<i64: 16, 64>}, {pipeline_mode = #tpu.pipeline_mode<synchronous>, transform_indices = @transform_8, window_bounds = array<i64: 1, 16>}, {pipeline_mode = #tpu.pipeline_mode<synchronous>, transform_indices = @transform_9, window_bounds = array<i64: 1, 16>}, {transform_indices = @transform_10, window_bounds = array<i64: 1, 32, 64>}]} {
    %c0 = arith.constant 0 : index
    %c0_0 = arith.constant 0 : index
    %c0_1 = arith.constant 0 : index
    %0 = vector.load %arg1[%c0, %c0_0, %c0_1] : memref<1x32x64xf32, #tpu.memory_space<vmem>>, vector<1x32x64xf32>
    %1 = vector.shape_cast %0 : vector<1x32x64xf32> to vector<32x64xf32>
    %c0_2 = arith.constant 0 : index
    %c0_3 = arith.constant 0 : index
    %2 = vector.load %arg2[%c0_2, %c0_3] : memref<32x32xf32, #tpu.memory_space<vmem>>, vector<32x32xf32>
    %c0_4 = arith.constant 0 : index
    %c0_5 = arith.constant 0 : index
    %3 = vector.load %arg3[%c0_4, %c0_5] : memref<64x64xf32, #tpu.memory_space<vmem>>, vector<64x64xf32>
    %cst = arith.constant dense<0.000000e+00> : vector<32x64xf32>
    %4 = tpu.matmul %1, %3, %cst {dimension_numbers = #tpu.dot_dimension_numbers<[1], [0], [0], [1], [0, 0, 1, 1], [], []>} : vector<32x64xf32>, vector<64x64xf32>, vector<32x64xf32> -> vector<32x64xf32>
    %c0_6 = arith.constant 0 : index
    %c0_7 = arith.constant 0 : index
    %5 = vector.load %arg4[%c0_6, %c0_7] : memref<1x64xf32, #tpu.memory_space<vmem>>, vector<1x64xf32>
    %6 = vector.broadcast %5 : vector<1x64xf32> to vector<32x64xf32>
    %7 = arith.addf %4, %6 : vector<32x64xf32>
    %8 = arith.mulf %7, %7 : vector<32x64xf32>
    %cst_8 = arith.constant dense<0.000000e+00> : vector<32x64xf32>
    %9 = tpu.matmul %2, %8, %cst_8 {dimension_numbers = #tpu.dot_dimension_numbers<[1], [0], [0], [1], [0, 0, 1, 1], [], []>} : vector<32x32xf32>, vector<32x64xf32>, vector<32x64xf32> -> vector<32x64xf32>
    %cst_9 = arith.constant 9.99999996E-13 : f32
    %10 = vector.broadcast %cst_9 : f32 to vector<32x64xf32>
    %11 = arith.maximumf %9, %10 : vector<32x64xf32>
    %12 = tpu.reciprocal %11 : vector<32x64xf32> -> vector<32x64xf32>
    %13 = arith.mulf %8, %12 : vector<32x64xf32>
    %c0_10 = arith.constant 0 : index
    %c0_11 = arith.constant 0 : index
    %14 = vector.load %arg7[%c0_10, %c0_11] : memref<64x16xf32, #tpu.memory_space<vmem>>, vector<64x16xf32>
    %cst_12 = arith.constant dense<0.000000e+00> : vector<32x16xf32>
    %15 = tpu.matmul %13, %14, %cst_12 {dimension_numbers = #tpu.dot_dimension_numbers<[1], [0], [0], [1], [0, 0, 1, 1], [], []>} : vector<32x64xf32>, vector<64x16xf32>, vector<32x16xf32> -> vector<32x16xf32>
    %c0_13 = arith.constant 0 : index
    %c0_14 = arith.constant 0 : index
    %16 = vector.load %arg10[%c0_13, %c0_14] : memref<1x16xf32, #tpu.memory_space<vmem>>, vector<1x16xf32>
    %17 = vector.broadcast %16 : vector<1x16xf32> to vector<32x16xf32>
    %18 = arith.addf %15, %17 : vector<32x16xf32>
    %c0_15 = arith.constant 0 : index
    %c0_16 = arith.constant 0 : index
    %19 = vector.load %arg9[%c0_15, %c0_16] : memref<1x16xf32, #tpu.memory_space<vmem>>, vector<1x16xf32>
    %20 = vector.broadcast %19 : vector<1x16xf32> to vector<32x16xf32>
    %21 = arith.mulf %18, %20 : vector<32x16xf32>
    %cst_17 = arith.constant dense<0xFF800000> : vector<16xf32>
    %22 = vector.multi_reduction <maximumf>, %21, %cst_17 [0] : vector<32x16xf32> to vector<16xf32>
    %23 = vector.shape_cast %22 : vector<16xf32> to vector<1x16xf32>
    %24 = vector.broadcast %23 : vector<1x16xf32> to vector<32x16xf32>
    %25 = arith.subf %21, %24 : vector<32x16xf32>
    %26 = math.exp %25 : vector<32x16xf32>
    %cst_18 = arith.constant dense<0.000000e+00> : vector<16xf32>
    %27 = vector.multi_reduction <add>, %26, %cst_18 [0] : vector<32x16xf32> to vector<16xf32>
    %28 = vector.shape_cast %27 : vector<16xf32> to vector<1x16xf32>
    %29 = tpu.reciprocal %28 : vector<1x16xf32> -> vector<1x16xf32>
    %30 = vector.broadcast %29 : vector<1x16xf32> to vector<32x16xf32>
    %31 = arith.mulf %26, %30 : vector<32x16xf32>
    %c0_19 = arith.constant 0 : index
    %c0_20 = arith.constant 0 : index
    %32 = vector.load %arg8[%c0_19, %c0_20] : memref<16x64xf32, #tpu.memory_space<vmem>>, vector<16x64xf32>
    %cst_21 = arith.constant dense<0.000000e+00> : vector<32x64xf32>
    %33 = tpu.matmul %31, %32, %cst_21 {dimension_numbers = #tpu.dot_dimension_numbers<[1], [0], [0], [1], [0, 0, 1, 1], [], []>} : vector<32x16xf32>, vector<16x64xf32>, vector<32x64xf32> -> vector<32x64xf32>
    %34 = arith.mulf %8, %33 : vector<32x64xf32>
    %cst_22 = arith.constant dense<0.000000e+00> : vector<32x64xf32>
    %35 = tpu.matmul %2, %34, %cst_22 {dimension_numbers = #tpu.dot_dimension_numbers<[1], [0], [0], [1], [0, 0, 1, 1], [], []>} : vector<32x32xf32>, vector<32x64xf32>, vector<32x64xf32> -> vector<32x64xf32>
    %cst_23 = arith.constant dense<0.000000e+00> : vector<32x16xf32>
    %36 = tpu.matmul %2, %31, %cst_23 {dimension_numbers = #tpu.dot_dimension_numbers<[1], [0], [0], [1], [0, 0, 1, 1], [], []>} : vector<32x32xf32>, vector<32x16xf32>, vector<32x16xf32> -> vector<32x16xf32>
    %cst_24 = arith.constant 9.99999993E-9 : f32
    %37 = vector.broadcast %cst_24 : f32 to vector<32x16xf32>
    %38 = arith.addf %36, %37 : vector<32x16xf32>
    %39 = tpu.reciprocal %38 : vector<32x16xf32> -> vector<32x16xf32>
    %c0_25 = arith.constant 0 : index
    %c0_26 = arith.constant 0 : index
    %40 = vector.load %arg8[%c0_25, %c0_26] : memref<16x64xf32, #tpu.memory_space<vmem>>, vector<16x64xf32>
    %cst_27 = arith.constant dense<0.000000e+00> : vector<32x64xf32>
    %41 = tpu.matmul %39, %40, %cst_27 {dimension_numbers = #tpu.dot_dimension_numbers<[1], [0], [0], [1], [0, 0, 1, 1], [], []>} : vector<32x16xf32>, vector<16x64xf32>, vector<32x64xf32> -> vector<32x64xf32>
    %42 = arith.mulf %35, %41 : vector<32x64xf32>
    %cst_28 = arith.constant 1.000000e+00 : f32
    %43 = vector.broadcast %cst_28 : f32 to vector<32x64xf32>
    %44 = arith.addf %43, %42 : vector<32x64xf32>
    %45 = tpu.reciprocal %44 : vector<32x64xf32> -> vector<32x64xf32>
    %46 = arith.mulf %7, %33 : vector<32x64xf32>
    %cst_29 = arith.constant 0.000000e+00 : f32
    %47 = vector.broadcast %cst_29 : f32 to vector<32x64xf32>
    %48 = arith.subf %47, %46 : vector<32x64xf32>
    %49 = arith.mulf %48, %45 : vector<32x64xf32>
    %c0_30 = arith.constant 0 : index
    %c0_31 = arith.constant 0 : index
    %50 = vector.load %arg5[%c0_30, %c0_31] : memref<64x64xf32, #tpu.memory_space<vmem>>, vector<64x64xf32>
    %cst_32 = arith.constant dense<0.000000e+00> : vector<32x64xf32>
    %51 = tpu.matmul %49, %50, %cst_32 {dimension_numbers = #tpu.dot_dimension_numbers<[1], [0], [0], [1], [0, 0, 1, 1], [], []>} : vector<32x64xf32>, vector<64x64xf32>, vector<32x64xf32> -> vector<32x64xf32>
    %c0_33 = arith.constant 0 : index
    %c0_34 = arith.constant 0 : index
    %52 = vector.load %arg6[%c0_33, %c0_34] : memref<1x64xf32, #tpu.memory_space<vmem>>, vector<1x64xf32>
    %53 = vector.broadcast %52 : vector<1x64xf32> to vector<32x64xf32>
    %54 = arith.addf %51, %53 : vector<32x64xf32>
    %55 = arith.addf %54, %1 : vector<32x64xf32>
    %cst_35 = arith.constant 0.000000e+00 : f32
    %56 = vector.broadcast %cst_35 : f32 to vector<32x64xf32>
    %57 = arith.maximumf %55, %56 : vector<32x64xf32>
    %c0_36 = arith.constant 0 : index
    %c0_37 = arith.constant 0 : index
    %c0_38 = arith.constant 0 : index
    %58 = vector.load %arg11[%c0_36, %c0_37, %c0_38] : memref<1x32x64xf32, #tpu.memory_space<vmem>>, vector<1x32x64xf32>
    %59 = vector.shape_cast %58 : vector<1x32x64xf32> to vector<32x64xf32>
    %60 = vector.shape_cast %57 : vector<32x64xf32> to vector<1x32x64xf32>
    tpu.vector_store %arg11[%c0_36, %c0_37, %c0_38], %60 {strides = array<i32>} : memref<1x32x64xf32, #tpu.memory_space<vmem>>, vector<1x32x64xf32>,
    return
  }
  func.func @transform_0(%arg0: i32) -> (i32, i32, i32) {
    %c0_i32 = arith.constant 0 : i32
    %c0_i32_0 = arith.constant 0 : i32
    %c0_i32_1 = arith.constant 0 : i32
    return %arg0, %c0_i32, %c0_i32_0 : i32, i32, i32
  }
  func.func @transform_1(%arg0: i32) -> (i32, i32) {
    %c0_i32 = arith.constant 0 : i32
    %c0_i32_0 = arith.constant 0 : i32
    %c0_i32_1 = arith.constant 0 : i32
    return %c0_i32, %c0_i32_0 : i32, i32
  }
  func.func @transform_2(%arg0: i32) -> (i32, i32) {
    %c0_i32 = arith.constant 0 : i32
    %c0_i32_0 = arith.constant 0 : i32
    %c0_i32_1 = arith.constant 0 : i32
    return %c0_i32, %c0_i32_0 : i32, i32
  }
  func.func @transform_3(%arg0: i32) -> (i32, i32) {
    %c0_i32 = arith.constant 0 : i32
    %c0_i32_0 = arith.constant 0 : i32
    %c0_i32_1 = arith.constant 0 : i32
    return %c0_i32, %c0_i32_0 : i32, i32
  }
  func.func @transform_4(%arg0: i32) -> (i32, i32) {
    %c0_i32 = arith.constant 0 : i32
    %c0_i32_0 = arith.constant 0 : i32
    %c0_i32_1 = arith.constant 0 : i32
    return %c0_i32, %c0_i32_0 : i32, i32
  }
  func.func @transform_5(%arg0: i32) -> (i32, i32) {
    %c0_i32 = arith.constant 0 : i32
    %c0_i32_0 = arith.constant 0 : i32
    %c0_i32_1 = arith.constant 0 : i32
    return %c0_i32, %c0_i32_0 : i32, i32
  }
  func.func @transform_6(%arg0: i32) -> (i32, i32) {
    %c0_i32 = arith.constant 0 : i32
    %c0_i32_0 = arith.constant 0 : i32
    %c0_i32_1 = arith.constant 0 : i32
    return %c0_i32, %c0_i32_0 : i32, i32
  }
  func.func @transform_7(%arg0: i32) -> (i32, i32) {
    %c0_i32 = arith.constant 0 : i32
    %c0_i32_0 = arith.constant 0 : i32
    %c0_i32_1 = arith.constant 0 : i32
    return %c0_i32, %c0_i32_0 : i32, i32
  }
  func.func @transform_8(%arg0: i32) -> (i32, i32) {
    %c0_i32 = arith.constant 0 : i32
    %c0_i32_0 = arith.constant 0 : i32
    %c0_i32_1 = arith.constant 0 : i32
    return %c0_i32, %c0_i32_0 : i32, i32
  }
  func.func @transform_9(%arg0: i32) -> (i32, i32) {
    %c0_i32 = arith.constant 0 : i32
    %c0_i32_0 = arith.constant 0 : i32
    %c0_i32_1 = arith.constant 0 : i32
    return %c0_i32, %c0_i32_0 : i32, i32
  }
  func.func @transform_10(%arg0: i32) -> (i32, i32, i32) {
    %c0_i32 = arith.constant 0 : i32
    %c0_i32_0 = arith.constant 0 : i32
    %c0_i32_1 = arith.constant 0 : i32
    return %arg0, %c0_i32, %c0_i32_0 : i32, i32, i32
  }
}

</mosaic_0001>

<bundles_post_ra>
// kernel: tpu_custom_call.1
= control target key start
LH: loop header
LB: loop body
LE: loop exit
PB: predicated region body
PF: predicated region fallthrough
CT: control target
= control target key end

     0   :  { %15 = vsyncpa [#allocation3], 0  ;;  %s1201_s0 = inlined_call_operand.hbm [shape: f32[1,32,64], index: 0, kind: input, shape index: {}]   ;;  %s1202_s1 = inlined_call_operand.hbm [shape: f32[32,32], index: 1, kind: input, shape index: {}]   ;;  %s1203_s2 = inlined_call_operand.vmem [shape: f32[64,64], index: 2, kind: input, shape index: {}]   ;;  %s1204_s3 = inlined_call_operand.vmem [shape: f32[1,64], index: 3, kind: input, shape index: {}]   ;;  %s1205_s4 = inlined_call_operand.hbm [shape: f32[64,64], index: 4, kind: input, shape index: {}]   ;;  %s1206_s5 = inlined_call_operand.vmem [shape: f32[1,64], index: 5, kind: input, shape index: {}]   ;;  %s1207_s6 = inlined_call_operand.vmem [shape: f32[64,16], index: 6, kind: input, shape index: {}]   ;;  %s1208_s7 = inlined_call_operand.vmem [shape: f32[16,64], index: 7, kind: input, shape index: {}]   ;;  %s1209_s8 = inlined_call_operand.vmem [shape: f32[1,16], index: 8, kind: input, shape index: {}]   ;;  %s1210_s9 = inlined_call_operand.vmem [shape: f32[1,16], index: 9, kind: input, shape index: {}]   ;;  %s1211_s10 = inlined_call_operand.hbm [shape: f32[1,32,64], index: 10, kind: output, shape index: {}]  }
   0x1   :  { %16 = vsyncpa [#allocation6], 0 }
   0x2   :  { %17 = vsyncpa [#allocation4], 0  ;;  %s35_s15 = sshll.u32 %s1202_s1, 4  ;;  %s914_s16 = smov [#allocation5]   ;;  %s36_s15 = int_to_ptr.hbm [resolvable:$true] %s35_s15 }
   0x3   :  { %s37_s17 = sshll.u32 %s914_s16, 4  ;;  %s22_s20 = sshll.u32 %s1201_s0, 4  ;;  %s38_s17 = int_to_ptr.vmem [resolvable:$true] %s37_s17  ;;  %s23_s20 = int_to_ptr.hbm [resolvable:$true] %s22_s20 }
   0x4   :  { %s915_s21 = smov 128   ;;  %s916_s22 = smov 8  }
   0x5   :  { %43 = dma.hbm_to_vmem [thread:$0]  %s36_s15, 512, %s38_s17, [#allocation6], %s915_s21, %s915_s21, %s916_s22  }
   0x6   :  { %s917_s23 = smov [#allocation2]   ;;  %s52_s1 = sshll.u32 %s1205_s4, 4  ;;  %s53_s1 = int_to_ptr.hbm [resolvable:$true] %s52_s1 }
   0x7   :  { %s24_s24 = sshll.u32 %s917_s23, 4  ;;  %s918_s0 = smov [#allocation7]   ;;  %s25_s24 = int_to_ptr.vmem [resolvable:$true] %s24_s24 }
   0x8   :  { %30 = dma.hbm_to_vmem [thread:$0]  %s23_s20, 512, %s25_s24, [#allocation3], %s915_s21, %s915_s21, %s916_s22  }
   0x9   :  { %s54_s27 = sshll.u32 %s918_s0, 4  ;;  %s55_s27 = int_to_ptr.vmem [resolvable:$true] %s54_s27 }
   0xa   :  { %60 = dma.hbm_to_vmem [thread:$0]  %s53_s1, 1024, %s55_s27, [#allocation6], %s915_s21, %s915_s21, %s916_s22  }
   0xb   :  { %908 = dma.done.wait [#allocation3], 512  }
   0xc   :  { %909 = vsyncadd [#allocation3], 4294966784 }
   0xd   :  { %910 = dma.done.wait [#allocation6], 1536  }
   0xe   :  { %911 = vsyncadd [#allocation6], 4294965760  ;;  %v98_v0 = vld [vmem:[%s1203_s2 + $0x38] sm:$0xff]  ;;  %v97_v1 = vld [vmem:[%s1203_s2 + $0x30] sm:$0xff]  ;;  %vm103_vm0 = vcmask 523264   ;;  %vm149_vm1 = vcmask 261120  }
   0xf   :  { %124 = vmatpush.msra.mxu0 %v98_v0  ;;  %v96_v2 = vld [vmem:[%s1203_s2 + $0x28] sm:$0xff]  ;;  %v95_v3 = vld [vmem:[%s1203_s2 + $0x20] sm:$0xff]  ;;  %v94_v4 = vld [vmem:[%s1203_s2 + $0x18] sm:$0xff]  ;;  %s722_s1 = sshll.u32 %s1211_s10, 4  ;;  %s723_s1 = int_to_ptr.hbm [resolvable:$true] %s722_s1 }
  0x10   :  { %v93_v5 = vld [vmem:[%s1203_s2 + $0x10] sm:$0xff]  ;;  %v92_v6 = vld [vmem:[%s1203_s2 + $0x8] sm:$0xff]  ;;  %v91_v7 = vld [vmem:[%s1203_s2] sm:$0xff] }
  0x11   :  { %125 = vmatpush.msra.mxu0 %v97_v1  ;;  %v1017_v8 = vld [vmem:[#allocation2] sm:$0xff]  ;;  %v1021_v9 = vld [vmem:[#allocation2 + $0x8] sm:$0xff]  ;;  %v1025_v10 = vld [vmem:[#allocation2 + $0x10] sm:$0xff] }
  0x12   :  { %v1029_v11 = vld [vmem:[#allocation2 + $0x18] sm:$0xff]  ;;  %v774_v15 = vld [vmem:[%s1204_s3] ss:$0 sm:$0xff]  ;;  %v1068_v26 = vld [vmem:[#allocation5 + $0x8] sm:$0xff] }
  0x13   :  { %126 = vmatpush.msra.mxu0 %v96_v2  ;;  %v1063_v25 = vld [vmem:[#allocation5] sm:$0xff]  ;;  %v1072_v27 = vld [vmem:[#allocation5 + $0x10] sm:$0xff]  ;;  %v1076_v28 = vld [vmem:[#allocation5 + $0x18] sm:$0xff] }
  0x14   :  { %v262_v29 = vld [vmem:[%s1207_s6 + $0x38] sm:$0xff]  ;;  %v261_v30 = vld [vmem:[%s1207_s6 + $0x30] sm:$0xff]  ;;  %v260_v31 = vld [vmem:[%s1207_s6 + $0x28] sm:$0xff] }
  0x15   :  { %127 = vmatpush.msra.mxu0 %v95_v3  ;;  %287 = vmatpush.msra.mxu2 %v262_v29  ;;  %v259_v32 = vld [vmem:[%s1207_s6 + $0x20] sm:$0xff]  ;;  %v258_v33 = vld [vmem:[%s1207_s6 + $0x18] sm:$0xff]  ;;  %v257_v34 = vld [vmem:[%s1207_s6 + $0x10] sm:$0xff] }
  0x16   :  { %v256_v35 = vld [vmem:[%s1207_s6 + $0x8] sm:$0xff]  ;;  %v255_v36 = vld [vmem:[%s1207_s6] sm:$0xff] }
  0x17   :  { %128 = vmatpush.msra.mxu0 %v94_v4  ;;  %288 = vmatpush.msra.mxu2 %v261_v30 }
  0x19   :  { %129 = vmatpush.msra.mxu0 %v93_v5  ;;  %289 = vmatpush.msra.mxu2 %v260_v31 }
  0x1b   :  { %130 = vmatpush.msra.mxu0 %v92_v6  ;;  %290 = vmatpush.msra.mxu2 %v259_v32 }
  0x1d   :  { %131 = vmatpush.msra.mxu0 %v91_v7  ;;  %291 = vmatpush.msra.mxu2 %v258_v33 }
  0x1e   :  { %736 = vmatmul.msk.f32.vlgmr.msra.gmra.mxu0 %vm103_vm0, %v1017_v8 }
  0x1f   :  { %292 = vmatpush.msra.mxu2 %v257_v34 }
  0x21   :  { %293 = vmatpush.msra.mxu2 %v256_v35 }
  0x23   :  { %294 = vmatpush.msra.mxu2 %v255_v36 }
  0x26   :  { %737 = vmatmul.msk.f32.gmra.mxu0 %vm103_vm0, %v1021_v9 }
  0x2e   :  { %738 = vmatmul.msk.f32.gmra.mxu0 %vm103_vm0, %v1025_v10 }
  0x36   :  { %739 = vmatmul.msk.f32.gmra.mxu0 %vm103_vm0, %v1029_v11 }
  0x9b   :  { %v133_v12 = vpop.f32.mrf.mxu0 }
  0x9c   :  { %v1046_v21 = vadd.f32 %v774_v15, %v133_v12 }
  0x9e   :  { %v1060_v24 = vmul.f32 %v1046_v21, %v1046_v21 }
  0xa3   :  { %v136_v13 = vpop.f32.mrf.mxu0 }
  0xa4   :  { %v1040_v19 = vadd.f32 %v774_v15, %v136_v13 }
  0xa6   :  { %v1055_v23 = vmul.f32 %v1040_v19, %v1040_v19 }
  0xab   :  { %v139_v14 = vpop.f32.mrf.mxu0 }
  0xac   :  { %v1036_v17 = vadd.f32 %v774_v15, %v139_v14 }
  0xae   :  { %v1050_v22 = vmul.f32 %v1036_v17, %v1036_v17 }
  0xb3   :  { %v142_v16 = vpop.f32.mrf.mxu0 }
  0xb4   :  { %v1038_v18 = vadd.f32 %v774_v15, %v142_v16 }
  0xb6   :  { %v1044_v20 = vmul.f32 %v1038_v18, %v1038_v18 }
  0xb8   :  { %174 = vmatpush.msra.mxu1 %v1044_v20 }
  0xba   :  { %175 = vmatpush.msra.mxu1 %v1050_v22 }
  0xbc   :  { %176 = vmatpush.msra.mxu1 %v1055_v23 }
  0xbe   :  { %177 = vmatpush.msra.mxu1 %v1060_v24 }
  0xbf   :  { %740 = vmatmul.msk.f32.vlgmr.msra.gmra.mxu1 %vm149_vm1, %v1063_v25 }
  0xc7   :  { %741 = vmatmul.msk.f32.gmra.mxu1 %vm149_vm1, %v1068_v26 }
  0xcf   :  { %742 = vmatmul.msk.f32.gmra.mxu1 %vm149_vm1, %v1072_v27 }
  0xd7   :  { %743 = vmatmul.msk.f32.gmra.mxu1 %vm149_vm1, %v1076_v28 }
 0x13c   :  { %v179_v37 = vpop.f32.mrf.mxu1 }
 0x13d   :  { %v191_v38 = vmax.f32 %v179_v37, 1e-12 }
 0x13f   :  { %778 = vrcp.f32 %v191_v38  ;;  %v206_v44 = vand.u32 2147483648, %v191_v38  ;;  %v204_v46 = vand.u32 2147483647, %v191_v38  ;;  %vm200_vm3 = vweird.f32 %v191_v38 }
 0x141   :  { %v207_v51 = vor.u32 1.1754944e-38, %v206_v44  ;;  %vm205_vm5 = vcmp.eq.f32.partialorder %v204_v46, 8.507059e+37  ;;  %v775_v44 = vld [vmem:[%s1210_s9] ss:$0 sm:$0xff] }
 0x144   :  { %v182_v39 = vpop.f32.mrf.mxu1 }
 0x145   :  { %v779_v40 = vpop.eup %778  ;;  %v192_v41 = vmax.f32 %v182_v39, 1e-12 }
 0x146   :  { %v196_v42 = vmul.f32 %v779_v40, %v191_v38  ;;  %vm201_vm2 = vweird.f32 %v779_v40 }
 0x147   :  { %780 = vrcp.f32 %v192_v41  ;;  %vm202_vm4 = vmor %vm200_vm3, %vm201_vm2  ;;  %v220_v57 = vand.u32 2147483648, %v192_v41  ;;  %v218_v59 = vand.u32 2147483647, %v192_v41  ;;  %vm214_vm7 = vweird.f32 %v192_v41 }
 0x148   :  { %v197_v43 = vsub.f32 1.0, %v196_v42 }
 0x149   :  { %v221_v0 = vor.u32 1.1754944e-38, %v220_v57  ;;  %vm219_vm9 = vcmp.eq.f32.partialorder %v218_v59, 8.507059e+37  ;;  %v373_v57 = vld [vmem:[%s1208_s7] sm:$0xff] }
 0x14a   :  { %v198_v45 = vmul.f32 %v779_v40, %v197_v43 }
 0x14c   :  { %v185_v47 = vpop.f32.mrf.mxu1  ;;  %v199_v48 = vadd.f32 %v779_v40, %v198_v45 }
 0x14d   :  { %v781_v49 = vpop.eup %780  ;;  %v193_v50 = vmax.f32 %v185_v47, 1e-12  ;;  %v776_v47 = vld [vmem:[%s1209_s8] ss:$0 sm:$0xff] }
 0x14e   :  { %v210_v52 = vmul.f32 %v781_v49, %v192_v41  ;;  %v203_v53 = vsel %vm202_vm4, %v779_v40, %v199_v48  ;;  %vm215_vm6 = vweird.f32 %v781_v49  ;;  %vm316_vm4 = vcmask 130048  }
 0x14f   :  { %782 = vrcp.f32 %v193_v50  ;;  %v208_v54 = vsel %vm205_vm5, %v207_v51, %v203_v53  ;;  %vm216_vm8 = vmor %vm214_vm7, %vm215_vm6  ;;  %v234_v6 = vand.u32 2147483648, %v193_v50  ;;  %v232_v12 = vand.u32 2147483647, %v193_v50 }
 0x150   :  { %v211_v55 = vsub.f32 1.0, %v210_v52  ;;  %v251_v56 = vmul.f32 %v208_v54, %v1060_v24  ;;  %vm228_vm11 = vweird.f32 %v193_v50 }
 0x151   :  { %v235_v15 = vor.u32 1.1754944e-38, %v234_v6  ;;  %vm233_vm13 = vcmp.eq.f32.partialorder %v232_v12, 8.507059e+37 }
 0x152   :  { %744 = vmatmul.msk.f32.vlgmr.msra.gmra.mxu2 %vm103_vm0, %v251_v56  ;;  %v212_v58 = vmul.f32 %v781_v49, %v211_v55  ;;  %v374_v56 = vld [vmem:[%s1208_s7 + $0x8] sm:$0xff] }
 0x153   :  { %401 = vmatpush.msra.mxu3 %v374_v56  ;;  %560 = vmatpush.msrb.mxu0 %v374_v56 }
 0x154   :  { %v188_v60 = vpop.f32.mrf.mxu1  ;;  %v213_v61 = vadd.f32 %v781_v49, %v212_v58 }
 0x155   :  { %v783_v62 = vpop.eup %782  ;;  %v194_v63 = vmax.f32 %v188_v60, 1e-12  ;;  %402 = vmatpush.msra.mxu3 %v373_v57  ;;  %561 = vmatpush.msrb.mxu0 %v373_v57 }
 0x156   :  { %v224_v1 = vmul.f32 %v783_v62, %v193_v50  ;;  %v217_v2 = vsel %vm216_vm8, %v781_v49, %v213_v61  ;;  %vm229_vm10 = vweird.f32 %v783_v62 }
 0x157   :  { %784 = vrcp.f32 %v194_v63  ;;  %v222_v3 = vsel %vm219_vm9, %v221_v0, %v217_v2  ;;  %vm230_vm12 = vmor %vm228_vm11, %vm229_vm10  ;;  %v248_v33 = vand.u32 2147483648, %v194_v63  ;;  %v246_v35 = vand.u32 2147483647, %v194_v63 }
 0x158   :  { %v225_v4 = vsub.f32 1.0, %v224_v1  ;;  %v252_v5 = vmul.f32 %v222_v3, %v1055_v23  ;;  %vm242_vm15 = vweird.f32 %v194_v63 }
 0x159   :  { %v249_v37 = vor.u32 1.1754944e-38, %v248_v33  ;;  %vm247_vm3 = vcmp.eq.f32.partialorder %v246_v35, 8.507059e+37 }
 0x15a   :  { %745 = vmatmul.msk.f32.gmra.mxu2 %vm103_vm0, %v252_v5  ;;  %v226_v7 = vmul.f32 %v783_v62, %v225_v4 }
 0x15c   :  { %v227_v13 = vadd.f32 %v783_v62, %v226_v7 }
 0x15d   :  { %v785_v14 = vpop.eup %784 }
 0x15e   :  { %v238_v16 = vmul.f32 %v785_v14, %v194_v63  ;;  %v231_v29 = vsel %vm230_vm12, %v783_v62, %v227_v13  ;;  %vm243_vm14 = vweird.f32 %v785_v14 }
 0x15f   :  { %v236_v30 = vsel %vm233_vm13, %v235_v15, %v231_v29  ;;  %vm244_vm2 = vmor %vm242_vm15, %vm243_vm14 }
 0x160   :  { %v239_v31 = vsub.f32 1.0, %v238_v16  ;;  %v253_v32 = vmul.f32 %v236_v30, %v1050_v22 }
 0x162   :  { %746 = vmatmul.msk.f32.gmra.mxu2 %vm103_vm0, %v253_v32  ;;  %v240_v34 = vmul.f32 %v785_v14, %v239_v31 }
 0x164   :  { %v241_v36 = vadd.f32 %v785_v14, %v240_v34 }
 0x166   :  { %v245_v38 = vsel %vm244_vm2, %v785_v14, %v241_v36 }
 0x167   :  { %v250_v39 = vsel %vm247_vm3, %v249_v37, %v245_v38 }
 0x168   :  { %v254_v40 = vmul.f32 %v250_v39, %v1044_v20 }
 0x16a   :  { %747 = vmatmul.msk.f32.gmra.mxu2 %vm103_vm0, %v254_v40 }
 0x1d5   :  { %v296_v41 = vpop.f32.mrf.mxu2 }
 0x1d6   :  { %v297_v46 = vadd.f32 %v775_v44, %v296_v41 }
 0x1d8   :  { %v312_v51 = vmul.f32 %v776_v47, %v297_v46 }
 0x1da   :  { %v317_v58 = vsel %vm316_vm4, %v312_v51, -inf }
 0x1dd   :  { %v299_v42 = vpop.f32.mrf.mxu2 }
 0x1de   :  { %v300_v45 = vadd.f32 %v775_v44, %v299_v42 }
 0x1e0   :  { %v313_v49 = vmul.f32 %v776_v47, %v300_v45 }
 0x1e2   :  { %v318_v54 = vsel %vm316_vm4, %v313_v49, -inf }
 0x1e3   :  { %v321_v61 = vmax.f32 %v317_v58, %v318_v54 }
 0x1e5   :  { %v302_v43 = vpop.f32.mrf.mxu2 }
 0x1e6   :  { %v303_v48 = vadd.f32 %v775_v44, %v302_v43 }
 0x1e8   :  { %v314_v52 = vmul.f32 %v776_v47, %v303_v48 }
 0x1ea   :  { %v319_v59 = vsel %vm316_vm4, %v314_v52, -inf }
 0x1ed   :  { %v305_v50 = vpop.f32.mrf.mxu2 }
 0x1ee   :  { %v306_v53 = vadd.f32 %v775_v44, %v305_v50 }
 0x1f0   :  { %v315_v55 = vmul.f32 %v776_v47, %v306_v53 }
 0x1f2   :  { %v320_v60 = vsel %vm316_vm4, %v315_v55, -inf }
 0x1f3   :  { %v322_v62 = vmax.f32 %v319_v59, %v320_v60 }
 0x1f5   :  { %v323_v63 = vmax.f32 %v321_v61, %v322_v62 }
 0x1f7   :  { %v324_v0 = vrot.slane %v323_v63, 4 }
 0x1f9   :  { %v325_v1 = vmax.f32 %v323_v63, %v324_v0 }
 0x1fb   :  { %v326_v2 = vrot.slane %v325_v1, 2 }
 0x1fd   :  { %v327_v3 = vmax.f32 %v325_v1, %v326_v2 }
 0x1ff   :  { %v328_v4 = vrot.slane %v327_v3, 1 }
 0x201   :  { %v329_v5 = vmax.f32 %v327_v3, %v328_v4 }
 0x203   :  { %v331_v6 = vsub.f32 %v313_v49, %v329_v5  ;;  %v332_v7 = vsub.f32 %v314_v52, %v329_v5  ;;  %v330_v12 = vsub.f32 %v312_v51, %v329_v5  ;;  %v333_v13 = vsub.f32 %v315_v55, %v329_v5 }
 0x205   :  { %v336_v14 = vmul.f32 1.442695, %v331_v6  ;;  %v338_v15 = vmul.f32 1.442695, %v332_v7  ;;  %v334_v16 = vmul.f32 1.442695, %v330_v12 }
 0x206   :  { %v340_v29 = vmul.f32 1.442695, %v333_v13 }
 0x207   :  { %786 = vpow2.f32 %v336_v14 }
 0x208   :  { %788 = vpow2.f32 %v338_v15 }
 0x209   :  { %790 = vpow2.f32 %v334_v16 }
 0x20a   :  { %792 = vpow2.f32 %v340_v29 }
 0x20d   :  { %v787_v30 = vpop.eup %786 }
 0x20e   :  { %v789_v31 = vpop.eup %788  ;;  %v343_v32 = vsel %vm316_vm4, %v787_v30, 0.0 }
 0x20f   :  { %v791_v33 = vpop.eup %790  ;;  %v345_v37 = vsel %vm316_vm4, %v789_v31, 0.0 }
 0x210   :  { %v342_v34 = vsel %vm316_vm4, %v791_v33, 0.0  ;;  %v793_v35 = vpop.eup %792 }
 0x211   :  { %v344_v36 = vadd.f32 %v343_v32, %v342_v34  ;;  %v347_v39 = vsel %vm316_vm4, %v793_v35, 0.0 }
 0x213   :  { %v346_v38 = vadd.f32 %v345_v37, %v344_v36 }
 0x215   :  { %v348_v40 = vadd.f32 %v347_v39, %v346_v38 }
 0x217   :  { %v349_v41 = vrot.slane %v348_v40, 4 }
 0x219   :  { %v350_v42 = vadd.f32 %v349_v41, %v348_v40 }
 0x21b   :  { %v351_v43 = vrot.slane %v350_v42, 2 }
 0x21d   :  { %v352_v44 = vadd.f32 %v351_v43, %v350_v42 }
 0x21f   :  { %v353_v45 = vrot.slane %v352_v44, 1 }
 0x221   :  { %v354_v46 = vadd.f32 %v353_v45, %v352_v44 }
 0x223   :  { %794 = vrcp.f32 %v354_v46  ;;  %v366_v50 = vand.u32 2147483648, %v354_v46  ;;  %v364_v52 = vand.u32 2147483647, %v354_v46  ;;  %vm360_vm6 = vweird.f32 %v354_v46 }
 0x225   :  { %v367_v54 = vor.u32 1.1754944e-38, %v366_v50  ;;  %vm365_vm8 = vcmp.eq.f32.partialorder %v364_v52, 8.507059e+37 }
 0x229   :  { %v795_v47 = vpop.eup %794 }
 0x22a   :  { %v356_v48 = vmul.f32 %v795_v47, %v354_v46  ;;  %vm361_vm5 = vweird.f32 %v795_v47 }
 0x22b   :  { %vm362_vm7 = vmor %vm360_vm6, %vm361_vm5 }
 0x22c   :  { %v357_v49 = vsub.f32 1.0, %v356_v48 }
 0x22e   :  { %v358_v51 = vmul.f32 %v795_v47, %v357_v49 }
 0x230   :  { %v359_v53 = vadd.f32 %v795_v47, %v358_v51 }
 0x232   :  { %v363_v55 = vsel %vm362_vm7, %v795_v47, %v359_v53 }
 0x233   :  { %v368_v56 = vsel %vm365_vm8, %v367_v54, %v363_v55 }
 0x234   :  { %v369_v57 = vmul.f32 %v791_v33, %v368_v56  ;;  %v372_v58 = vmul.f32 %v793_v35, %v368_v56  ;;  %v371_v59 = vmul.f32 %v789_v31, %v368_v56  ;;  %v370_v60 = vmul.f32 %v787_v30, %v368_v56 }
 0x236   :  { %748 = vmatmul.msk.f32.vlgmr.msra.gmra.mxu3 %vm316_vm4, %v369_v57  ;;  %461 = vmatpush.msrb.mxu1 %v372_v58 }
 0x238   :  { %462 = vmatpush.msrb.mxu1 %v371_v59 }
 0x23a   :  { %463 = vmatpush.msrb.mxu1 %v370_v60 }
 0x23c   :  { %464 = vmatpush.msrb.mxu1 %v369_v57 }
 0x23d   :  { %756 = vmatmul.msk.f32.vlgmr.msrb.gmra.mxu1 %vm149_vm1, %v1063_v25 }
 0x23e   :  { %749 = vmatmul.msk.f32.gmra.mxu3 %vm316_vm4, %v370_v60 }
 0x245   :  { %757 = vmatmul.msk.f32.gmra.mxu1 %vm149_vm1, %v1068_v26 }
 0x246   :  { %750 = vmatmul.msk.f32.gmra.mxu3 %vm316_vm4, %v371_v59 }
 0x24d   :  { %758 = vmatmul.msk.f32.gmra.mxu1 %vm149_vm1, %v1072_v27 }
 0x24e   :  { %751 = vmatmul.msk.f32.gmra.mxu3 %vm316_vm4, %v372_v58 }
 0x255   :  { %759 = vmatmul.msk.f32.gmra.mxu1 %vm149_vm1, %v1076_v28 }
 0x2b9   :  { %v1144_v61 = vpop.f32.mrf.mxu3 }
 0x2ba   :  { %v466_v62 = vpop.f32.mrf.mxu1  ;;  %v416_v52 = vmul.f32 %v1144_v61, %v1060_v24 }
 0x2bb   :  { %v467_v63 = vadd.f32 1e-08, %v466_v62 }
 0x2bd   :  { %796 = vrcp.f32 %v467_v63  ;;  %v489_v5 = vand.u32 2147483648, %v467_v63  ;;  %vm483_vm9 = vweird.f32 %v467_v63  ;;  %v487_v7 = vand.u32 2147483647, %v467_v63 }
 0x2bf   :  { %v490_v14 = vor.u32 1.1754944e-38, %v489_v5  ;;  %vm488_vm12 = vcmp.eq.f32.partialorder %v487_v7, 8.507059e+37  ;;  %v655_v5 = vld [vmem:[#allocation7 + $0x20] sm:$0xff]  ;;  %v652_v7 = vld [vmem:[#allocation7 + $0x8] sm:$0xff] }
 0x2c1   :  { %v1146_v0 = vpop.f32.mrf.mxu3 }
 0x2c2   :  { %v469_v1 = vpop.f32.mrf.mxu1  ;;  %v417_v48 = vmul.f32 %v1146_v0, %v1055_v23 }
 0x2c3   :  { %v797_v2 = vpop.eup %796  ;;  %v470_v3 = vadd.f32 1e-08, %v469_v1 }
 0x2c4   :  { %v479_v4 = vmul.f32 %v797_v2, %v467_v63  ;;  %vm484_vm10 = vweird.f32 %v797_v2 }
 0x2c5   :  { %798 = vrcp.f32 %v470_v3  ;;  %vm485_vm11 = vmor %vm483_vm9, %vm484_vm10  ;;  %v503_v34 = vand.u32 2147483648, %v470_v3  ;;  %vm497_vm13 = vweird.f32 %v470_v3  ;;  %v501_v36 = vand.u32 2147483647, %v470_v3 }
 0x2c6   :  { %v480_v6 = vsub.f32 1.0, %v479_v4  ;;  %v656_v4 = vld [vmem:[#allocation7 + $0x28] sm:$0xff] }
 0x2c7   :  { %v504_v39 = vor.u32 1.1754944e-38, %v503_v34  ;;  %vm502_vm2 = vcmp.eq.f32.partialorder %v501_v36, 8.507059e+37 }
 0x2c8   :  { %v481_v12 = vmul.f32 %v797_v2, %v480_v6  ;;  %v654_v6 = vld [vmem:[#allocation7 + $0x18] sm:$0xff] }
 0x2c9   :  { %v1148_v13 = vpop.f32.mrf.mxu3 }
 0x2ca   :  { %v472_v15 = vpop.f32.mrf.mxu1  ;;  %v482_v16 = vadd.f32 %v797_v2, %v481_v12  ;;  %v418_v45 = vmul.f32 %v1148_v13, %v1050_v22  ;;  %v651_v12 = vld [vmem:[#allocation7] sm:$0xff] }
 0x2cb   :  { %v799_v29 = vpop.eup %798  ;;  %v473_v30 = vadd.f32 1e-08, %v472_v15 }
 0x2cc   :  { %v486_v31 = vsel %vm485_vm11, %v797_v2, %v482_v16  ;;  %v493_v32 = vmul.f32 %v799_v29, %v470_v3  ;;  %vm498_vm14 = vweird.f32 %v799_v29  ;;  %v658_v2 = vld [vmem:[#allocation7 + $0x38] sm:$0xff]  ;;  %v657_v3 = vld [vmem:[#allocation7 + $0x30] sm:$0xff] }
 0x2cd   :  { %800 = vrcp.f32 %v473_v30  ;;  %v491_v33 = vsel %vm488_vm12, %v490_v14, %v486_v31  ;;  %vm499_vm15 = vmor %vm497_vm13, %vm498_vm14  ;;  %v517_v50 = vand.u32 2147483648, %v473_v30  ;;  %vm511_vm3 = vweird.f32 %v473_v30  ;;  %683 = vmatpush.msrb.mxu2 %v658_v2 }
 0x2ce   :  { %760 = vmatmul.msk.f32.vlgmr.msrb.gmra.mxu0 %vm316_vm4, %v491_v33  ;;  %v494_v35 = vsub.f32 1.0, %v493_v32  ;;  %v515_v51 = vand.u32 2147483647, %v473_v30 }
 0x2cf   :  { %v518_v53 = vor.u32 1.1754944e-38, %v517_v50  ;;  %684 = vmatpush.msrb.mxu2 %v657_v3 }
 0x2d0   :  { %v495_v37 = vmul.f32 %v799_v29, %v494_v35  ;;  %vm516_vm7 = vcmp.eq.f32.partialorder %v515_v51, 8.507059e+37 }
 0x2d1   :  { %v1151_v38 = vpop.f32.mrf.mxu3  ;;  %685 = vmatpush.msrb.mxu2 %v656_v4 }
 0x2d2   :  { %v419_v40 = vmul.f32 %v1151_v38, %v1044_v20  ;;  %v475_v41 = vpop.f32.mrf.mxu1  ;;  %v496_v42 = vadd.f32 %v799_v29, %v495_v37  ;;  %v639_v37 = vmul.f32 %v1144_v61, %v1046_v21  ;;  %v640_v61 = vmul.f32 %v1146_v0, %v1040_v19 }
 0x2d3   :  { %v801_v43 = vpop.eup %800  ;;  %v476_v44 = vadd.f32 1e-08, %v475_v41  ;;  %686 = vmatpush.msrb.mxu2 %v655_v5 }
 0x2d4   :  { %432 = vmatpush.msrb.mxu3 %v419_v40  ;;  %v500_v46 = vsel %vm499_vm15, %v799_v29, %v496_v42  ;;  %v507_v47 = vmul.f32 %v801_v43, %v473_v30  ;;  %vm512_vm5 = vweird.f32 %v801_v43 }
 0x2d5   :  { %802 = vrcp.f32 %v476_v44  ;;  %v505_v49 = vsel %vm502_vm2, %v504_v39, %v500_v46  ;;  %vm513_vm6 = vmor %vm511_vm3, %vm512_vm5  ;;  %v531_v58 = vand.u32 2147483648, %v476_v44  ;;  %vm525_vm8 = vweird.f32 %v476_v44  ;;  %687 = vmatpush.msrb.mxu2 %v654_v6 }
 0x2d6   :  { %433 = vmatpush.msrb.mxu3 %v418_v45  ;;  %761 = vmatmul.msk.f32.gmra.mxu0 %vm316_vm4, %v505_v49  ;;  %v508_v20 = vsub.f32 1.0, %v507_v47  ;;  %v529_v24 = vand.u32 2147483647, %v476_v44  ;;  %v643_v47 = vsub.f32 0.0, %v639_v37 }
 0x2d7   :  { %v532_v62 = vor.u32 1.1754944e-38, %v531_v58 }
 0x2d8   :  { %434 = vmatpush.msrb.mxu3 %v417_v48  ;;  %v509_v22 = vmul.f32 %v801_v43, %v508_v20  ;;  %vm530_vm11 = vcmp.eq.f32.partialorder %v529_v24, 8.507059e+37 }
 0x2da   :  { %435 = vmatpush.msrb.mxu3 %v416_v52  ;;  %v510_v54 = vadd.f32 %v801_v43, %v509_v22 }
 0x2db   :  { %v803_v23 = vpop.eup %802  ;;  %752 = vmatmul.msk.f32.vlgmr.msrb.gmra.mxu3 %vm149_vm1, %v1063_v25 }
 0x2dc   :  { %v521_v55 = vmul.f32 %v803_v23, %v476_v44  ;;  %v514_v56 = vsel %vm513_vm6, %v801_v43, %v510_v54  ;;  %vm526_vm9 = vweird.f32 %v803_v23 }
 0x2dd   :  { %v519_v57 = vsel %vm516_vm7, %v518_v53, %v514_v56  ;;  %vm527_vm10 = vmor %vm525_vm8, %vm526_vm9 }
 0x2de   :  { %762 = vmatmul.msk.f32.gmra.mxu0 %vm316_vm4, %v519_v57  ;;  %v522_v59 = vsub.f32 1.0, %v521_v55 }
 0x2e0   :  { %v523_v60 = vmul.f32 %v803_v23, %v522_v59  ;;  %v644_v59 = vsub.f32 0.0, %v640_v61 }
 0x2e2   :  { %v524_v63 = vadd.f32 %v803_v23, %v523_v60 }
 0x2e3   :  { %753 = vmatmul.msk.f32.gmra.mxu3 %vm149_vm1, %v1068_v26  ;;  %v653_v26 = vld [vmem:[#allocation7 + $0x10] sm:$0xff] }
 0x2e4   :  { %v528_v1 = vsel %vm527_vm10, %v803_v23, %v524_v63  ;;  %688 = vmatpush.msrb.mxu2 %v653_v26 }
 0x2e5   :  { %v533_v25 = vsel %vm530_vm11, %v532_v62, %v528_v1  ;;  %v641_v1 = vmul.f32 %v1148_v13, %v1036_v17  ;;  %v642_v17 = vmul.f32 %v1151_v38, %v1038_v18  ;;  %v777_v18 = vld [vmem:[%s1206_s5] ss:$0 sm:$0xff]  ;;  %s919_s5 = smov [#allocation8]  }
 0x2e6   :  { %763 = vmatmul.msk.f32.gmra.mxu0 %vm316_vm4, %v533_v25  ;;  %689 = vmatpush.msrb.mxu2 %v652_v7  ;;  %s720_s25 = sshll.u32 %s919_s5, 4  ;;  %s721_s25 = int_to_ptr.vmem [resolvable:$true] %s720_s25 }
 0x2e7   :  { %v645_v6 = vsub.f32 0.0, %v641_v1 }
 0x2e8   :  { %690 = vmatpush.msrb.mxu2 %v651_v12 }
 0x2eb   :  { %754 = vmatmul.msk.f32.gmra.mxu3 %vm149_vm1, %v1072_v27 }
 0x2f3   :  { %755 = vmatmul.msk.f32.gmra.mxu3 %vm149_vm1, %v1076_v28 }
 0x34b   :  { %v563_v27 = vpop.f32.mrf.mxu0 }
 0x353   :  { %v566_v16 = vpop.f32.mrf.mxu0 }
 0x35b   :  { %v569_v35 = vpop.f32.mrf.mxu0 }
 0x35e   :  { %v437_v14 = vpop.f32.mrf.mxu3 }
 0x35f   :  { %v575_v15 = vmul.f32 %v563_v27, %v437_v14 }
 0x361   :  { %v579_v28 = vadd.f32 1.0, %v575_v15 }
 0x363   :  { %804 = vrcp.f32 %v579_v28  ;;  %v594_v36 = vand.u32 2147483648, %v579_v28  ;;  %v592_v41 = vand.u32 2147483647, %v579_v28  ;;  %vm588_vm4 = vweird.f32 %v579_v28  ;;  %v572_v22 = vpop.f32.mrf.mxu0 }
 0x365   :  { %v595_v46 = vor.u32 1.1754944e-38, %v594_v36  ;;  %vm593_vm13 = vcmp.eq.f32.partialorder %v592_v41, 8.507059e+37 }
 0x366   :  { %v440_v29 = vpop.f32.mrf.mxu3 }
 0x367   :  { %v576_v30 = vmul.f32 %v566_v16, %v440_v29 }
 0x369   :  { %v805_v31 = vpop.eup %804  ;;  %v580_v32 = vadd.f32 1.0, %v576_v30  ;;  %v646_v30 = vsub.f32 0.0, %v642_v17 }
 0x36a   :  { %v584_v33 = vmul.f32 %v805_v31, %v579_v28  ;;  %vm589_vm1 = vweird.f32 %v805_v31 }
 0x36b   :  { %806 = vrcp.f32 %v580_v32  ;;  %vm590_vm12 = vmor %vm588_vm4, %vm589_vm1  ;;  %v608_v21 = vand.u32 2147483648, %v580_v32  ;;  %v606_v54 = vand.u32 2147483647, %v580_v32  ;;  %vm602_vm15 = vweird.f32 %v580_v32 }
 0x36c   :  { %v585_v34 = vsub.f32 1.0, %v584_v33 }
 0x36d   :  { %v609_v58 = vor.u32 1.1754944e-38, %v608_v21  ;;  %vm607_vm3 = vcmp.eq.f32.partialorder %v606_v54, 8.507059e+37 }
 0x36e   :  { %v586_v39 = vmul.f32 %v805_v31, %v585_v34  ;;  %v443_v40 = vpop.f32.mrf.mxu3 }
 0x36f   :  { %v577_v42 = vmul.f32 %v569_v35, %v443_v40 }
 0x370   :  { %v587_v43 = vadd.f32 %v805_v31, %v586_v39 }
 0x371   :  { %v807_v44 = vpop.eup %806  ;;  %v581_v45 = vadd.f32 1.0, %v577_v42 }
 0x372   :  { %v598_v48 = vmul.f32 %v807_v44, %v580_v32  ;;  %v591_v49 = vsel %vm590_vm12, %v805_v31, %v587_v43  ;;  %vm603_vm14 = vweird.f32 %v807_v44 }
 0x373   :  { %808 = vrcp.f32 %v581_v45  ;;  %v596_v50 = vsel %vm593_vm13, %v595_v46, %v591_v49  ;;  %vm604_vm2 = vmor %vm602_vm15, %vm603_vm14  ;;  %v622_v63 = vand.u32 2147483648, %v581_v45  ;;  %v620_v2 = vand.u32 2147483647, %v581_v45 }
 0x374   :  { %v599_v20 = vsub.f32 1.0, %v598_v48  ;;  %v647_v51 = vmul.f32 %v643_v47, %v596_v50  ;;  %vm616_vm6 = vweird.f32 %v581_v45 }
 0x375   :  { %v623_v5 = vor.u32 1.1754944e-38, %v622_v63  ;;  %vm621_vm8 = vcmp.eq.f32.partialorder %v620_v2, 8.507059e+37 }
 0x376   :  { %v446_v52 = vpop.f32.mrf.mxu3  ;;  %764 = vmatmul.msk.f32.vlgmr.msrb.gmra.mxu2 %vm103_vm0, %v647_v51  ;;  %v600_v53 = vmul.f32 %v807_v44, %v599_v20 }
 0x377   :  { %v578_v23 = vmul.f32 %v572_v22, %v446_v52 }
 0x378   :  { %v601_v55 = vadd.f32 %v807_v44, %v600_v53 }
 0x379   :  { %v809_v56 = vpop.eup %808  ;;  %v582_v57 = vadd.f32 1.0, %v578_v23 }
 0x37a   :  { %v612_v24 = vmul.f32 %v809_v56, %v581_v45  ;;  %v605_v60 = vsel %vm604_vm2, %v807_v44, %v601_v55  ;;  %vm617_vm5 = vweird.f32 %v809_v56 }
 0x37b   :  { %810 = vrcp.f32 %v582_v57  ;;  %v610_v19 = vsel %vm607_vm3, %v609_v58, %v605_v60  ;;  %vm618_vm7 = vmor %vm616_vm6, %vm617_vm5  ;;  %v636_v15 = vand.u32 2147483648, %v582_v57  ;;  %v634_v28 = vand.u32 2147483647, %v582_v57 }
 0x37c   :  { %v613_v0 = vsub.f32 1.0, %v612_v24  ;;  %v648_v62 = vmul.f32 %v644_v59, %v610_v19  ;;  %vm630_vm10 = vweird.f32 %v582_v57 }
 0x37d   :  { %v637_v29 = vor.u32 1.1754944e-38, %v636_v15  ;;  %vm635_vm1 = vcmp.eq.f32.partialorder %v634_v28, 8.507059e+37 }
 0x37e   :  { %765 = vmatmul.msk.f32.gmra.mxu2 %vm103_vm0, %v648_v62  ;;  %v614_v25 = vmul.f32 %v809_v56, %v613_v0 }
 0x380   :  { %v615_v3 = vadd.f32 %v809_v56, %v614_v25 }
 0x381   :  { %v811_v4 = vpop.eup %810 }
 0x382   :  { %v626_v26 = vmul.f32 %v811_v4, %v582_v57  ;;  %v619_v7 = vsel %vm618_vm7, %v809_v56, %v615_v3  ;;  %vm631_vm9 = vweird.f32 %v811_v4 }
 0x383   :  { %v624_v12 = vsel %vm621_vm8, %v623_v5, %v619_v7  ;;  %vm632_vm11 = vmor %vm630_vm10, %vm631_vm9 }
 0x384   :  { %v627_v27 = vsub.f32 1.0, %v626_v26  ;;  %v649_v14 = vmul.f32 %v645_v6, %v624_v12 }
 0x386   :  { %766 = vmatmul.msk.f32.gmra.mxu2 %vm103_vm0, %v649_v14  ;;  %v628_v13 = vmul.f32 %v811_v4, %v627_v27 }
 0x388   :  { %v629_v16 = vadd.f32 %v811_v4, %v628_v13 }
 0x38a   :  { %v633_v31 = vsel %vm632_vm11, %v811_v4, %v629_v16 }
 0x38b   :  { %v638_v32 = vsel %vm635_vm1, %v637_v29, %v633_v31 }
 0x38c   :  { %v650_v33 = vmul.f32 %v646_v30, %v638_v32 }
 0x38e   :  { %767 = vmatmul.msk.f32.gmra.mxu2 %vm103_vm0, %v650_v33 }
 0x3f9   :  { %v692_v38 = vpop.f32.mrf.mxu2 }
 0x3fa   :  { %v693_v34 = vadd.f32 %v777_v18, %v692_v38 }
 0x3fc   :  { %v704_v35 = vadd.f32 %v693_v34, %v1017_v8 }
 0x3fe   :  { %v708_v36 = vmax.f32 %v704_v35, 0.0 }
 0x400   :  { %712 = vst.msk [vmem:[#allocation8] sm:$0xff] %vm103_vm0, %v708_v36 }
 0x401   :  { %v695_v37 = vpop.f32.mrf.mxu2 }
 0x402   :  { %v696_v39 = vadd.f32 %v777_v18, %v695_v37 }
 0x404   :  { %v705_v40 = vadd.f32 %v696_v39, %v1021_v9 }
 0x406   :  { %v709_v41 = vmax.f32 %v705_v40, 0.0 }
 0x408   :  { %713 = vst.msk [vmem:[#allocation8 + $0x8] sm:$0xff] %vm103_vm0, %v709_v41 }
 0x409   :  { %v698_v42 = vpop.f32.mrf.mxu2 }
 0x40a   :  { %v699_v43 = vadd.f32 %v777_v18, %v698_v42 }
 0x40c   :  { %v706_v44 = vadd.f32 %v699_v43, %v1025_v10 }
 0x40e   :  { %v710_v45 = vmax.f32 %v706_v44, 0.0 }
 0x410   :  { %714 = vst.msk [vmem:[#allocation8 + $0x10] sm:$0xff] %vm103_vm0, %v710_v45 }
 0x411   :  { %v701_v46 = vpop.f32.mrf.mxu2 }
 0x412   :  { %v702_v47 = vadd.f32 %v777_v18, %v701_v46 }
 0x414   :  { %v707_v8 = vadd.f32 %v702_v47, %v1029_v11 }
 0x416   :  { %v711_v9 = vmax.f32 %v707_v8, 0.0 }
 0x418   :  { %715 = vst.msk [vmem:[#allocation8 + $0x18] sm:$0xff] %vm103_vm0, %v711_v9 }
 0x419   :  { %728 = dma.vmem_to_hbm [thread:$0]  %s721_s25, 512, %s723_s1, [#allocation4], %s915_s21, %s915_s21, %s916_s22  }
 0x41a   :  { %912 = dma.done.wait [#allocation4], 512  }
 0x41b   :  { %913 = vsyncadd [#allocation4], 4294966784 }
 0x41c   :  { %733 = vsyncpa [#allocation3], 1 }
 0x41d   :  { %734 = vsyncpa [#allocation6], 1 }
 0x41e   :  { %735 = vsyncpa [#allocation4], 1 }

</bundles_post_ra>
